<compile_context>
chip_gen: v7x
topology: tpu7x:2x2x1
jax: 0.10.0
libtpu: 0.0.40
codegen_flags: <defaults>
</compile_context>

<pallas_src>
import functools

import jax
import jax.numpy as jnp
from jax.experimental import pallas as pl
from jax.experimental.pallas import tpu as pltpu

LN_EPS = 1e-5


def _tpu_vmem_capacity_and_cores():
    """Best-effort per-TensorCore VMEM capacity and TensorCores per device."""
    try:
        vmem_cap = int(pltpu.get_tpu_info().vmem_capacity_bytes)
    except Exception:
        vmem_cap = 64 << 20  # conservative (v7x-sized) fallback
    # Only v7x-class parts have <= 64 MiB VMEM per TensorCore, and those carry two
    # TensorCores per device; v5e/v6e (128 MiB) have one.
    n_cores = 2 if vmem_cap <= (64 << 20) else 1
    return vmem_cap, n_cores


# ----------------------------------------------------------------------------------
# Fused kernel: one (tb, C, HW) block per grid step (softmax + attention + gate).
# ----------------------------------------------------------------------------------
def _psa_channel_kernel(x_ref, wv_wT_ref, wv_b_ref, wq_col_ref, wz_wT_ref,
                        wz_b_ref, wq_b_ref, ln_g_ref, ln_b_ref, out_ref):
    # Block is (TB, C, HW): channels on sublanes, full spatial extent on lanes.
    x_b = x_ref[...].astype(jnp.float32)                                   # (TB, C, HW)

    # ---- xq = softmax(Conv1x1(C->1)(x)) over HW -----------------------------------
    # M=1 projection on the VPU: broadcast-multiply + sublane reduce over C (no MXU
    # sweep for a single output row).  Mosaic masks the partial-lane tail of HW in
    # the reductions, so no explicit lane mask is needed.
    logits = jnp.sum(x_b * wq_col_ref[...][None, :, :], axis=1,
                     keepdims=True) + wq_b_ref[0]                          # (TB, 1, HW)
    m = jnp.max(logits, axis=-1, keepdims=True)
    e = jnp.exp(logits - m)
    q = e / jnp.sum(e, axis=-1, keepdims=True)      # exact divide: keeps sum(q) == 1

    # ---- att = xv @ xq, with the (ch, HW) intermediate eliminated ------------------
    # xv = Wv x + bv and the softmax weights sum to 1  =>  att = Wv @ sum_HW(x*q) + bv.
    r = jnp.sum(x_b * q, axis=-1)                                          # (TB, C)
    att = jnp.dot(r, wv_wT_ref[...],
                  preferred_element_type=jnp.float32) + wv_b_ref[...]      # (TB, ch)

    # ---- z = Conv1x1(ch->C)(att) ----------------------------------------------------
    z = jnp.dot(att, wz_wT_ref[...],
                preferred_element_type=jnp.float32) + wz_b_ref[...]        # (TB, C)

    # ---- LayerNorm(normalized_shape=1) + sigmoid ------------------------------------
    # Over a size-1 trailing dim: mean == z and var == 0, so the normalized value is
    # exactly 0 and ln == beta (gamma multiplies 0).  The attention math above is
    # kept so the kernel mirrors the PyTorch module; Mosaic DCEs it at zero cost.
    ln = jnp.zeros_like(z) * ln_g_ref[0] + ln_b_ref[0]                     # (TB, C)
    s = jax.nn.sigmoid(ln)                                                 # channel gate

    out_ref[...] = (x_b * s[:, :, None]).astype(out_ref.dtype)


def _psa_channel_fused(x, params, *, budget, vmem_cap, n_cores):
    bs, C, HW = x.shape
    ch = params["wv_w"].shape[0]

    # Small weights pre-arranged so the kernel needs no in-kernel transposes.
    wv_wT = params["wv_w"].T                   # (C, ch)
    wv_b = params["wv_b"].reshape(1, ch)
    wq_col = params["wq_w"].reshape(C, 1)
    wz_wT = params["wz_w"].T                   # (ch, C)
    wz_b = params["wz_b"].reshape(1, C)
    wq_b = params["wq_b"].reshape(1)           # scalars -> SMEM
    ln_g = params["ln_g"].reshape(1)
    ln_b = params["ln_b"].reshape(1)

    # Per-batch VMEM need: input + output double-buffered at native dtype, plus
    # headroom for up to three (C, HW) f32 temporaries (upcast block and the two
    # products feeding the reductions) in case Mosaic does not fuse mul+reduce.
    blk_io = C * HW * x.dtype.itemsize
    blk_f32 = C * HW * 4
    per_batch_need = 4 * blk_io + 3 * blk_f32

    # Batch folding: amortize the ~0.35us per-grid-step overhead.  Keep >= n_cores
    # grid steps only on multi-TC parts (v7x); on single-TC v5e/v6e fold everything.
    tb = 1
    for d in range(1, bs + 1):
        if bs % d:
            continue
        fits = d * per_batch_need <= budget
        steps_ok = (n_cores == 1) or (bs // d >= n_cores)
        if fits and steps_ok:
            tb = d
    nsteps = bs // tb

    vmem_limit = int(min(max(tb * per_batch_need + (4 << 20), 32 << 20),
                         vmem_cap - (8 << 20)))

    vfull = lambda shape: pl.BlockSpec(shape, lambda b, _s=shape: (0,) * len(_s))
    smem = pl.BlockSpec(memory_space=pltpu.MemorySpace.SMEM)

    return pl.pallas_call(
        _psa_channel_kernel,
        out_shape=jax.ShapeDtypeStruct((bs, C, HW), x.dtype),
        grid=(nsteps,),
        in_specs=[
            pl.BlockSpec((tb, C, HW), lambda b: (b, 0, 0)),    # x (batch-folded)
            vfull((C, ch)),                                    # Wv^T
            vfull((1, ch)),                                    # bv
            vfull((C, 1)),                                     # Wq as a column
            vfull((ch, C)),                                    # Wz^T
            vfull((1, C)),                                     # bz
            smem,                                              # wq bias (scalar)
            smem,                                              # LayerNorm gamma
            smem,                                              # LayerNorm beta
        ],
        out_specs=pl.BlockSpec((tb, C, HW), lambda b: (b, 0, 0)),
        compiler_params=pltpu.CompilerParams(
            dimension_semantics=("parallel",),
            vmem_limit_bytes=vmem_limit),
    )(x, wv_wT, wv_b, wq_col, wz_wT, wz_b, wq_b, ln_g, ln_b)


# ----------------------------------------------------------------------------------
# HW-tiled fallback: (batch, HW-tile) parallel grid, streaming elementwise gate.
# ----------------------------------------------------------------------------------
def _psa_gate_kernel(x_ref, ln_b_ref, out_ref):
    # LayerNorm(normalized_shape=1) normalizes z to exactly 0 (mean == z, var == 0),
    # so the channel gate is sigmoid(beta) for every batch/channel and is independent
    # of the attention output.  The tiled path therefore needs no online-softmax
    # statistics or a second sweep over x and stays a single 1R+1W streaming pass.
    # TODO(synk): if the norm were over a non-degenerate axis, add an online-softmax
    # stats pass (m, l, r accumulated over HW tiles) followed by a gating sweep.
    s = jax.nn.sigmoid(ln_b_ref[0].astype(jnp.float32))
    out_ref[...] = (x_ref[...].astype(jnp.float32) * s).astype(out_ref.dtype)


def _psa_channel_tiled(x, params, *, budget, vmem_cap, hw_tile=None):
    bs, C, HW = x.shape
    ln_b = params["ln_b"].reshape(1)

    # Lane-dense HW tile: largest multiple of 128 that keeps in+out double-buffers
    # plus f32 temporaries under budget (clamped to the full HW).
    per_col = 4 * C * x.dtype.itemsize + 3 * C * 4
    if hw_tile is not None:
        t_hw = max(128, (int(hw_tile) // 128) * 128)
    else:
        t_hw = max(128, (int(budget // per_col) // 128) * 128)
    t_hw = min(t_hw, HW)
    n_hw = pl.cdiv(HW, t_hw)

    vmem_limit = int(min(max(t_hw * per_col + (4 << 20), 32 << 20),
                         vmem_cap - (8 << 20)))

    return pl.pallas_call(
        _psa_gate_kernel,
        out_shape=jax.ShapeDtypeStruct((bs, C, HW), x.dtype),
        grid=(bs, n_hw),
        in_specs=[
            pl.BlockSpec((1, C, t_hw), lambda b, h: (b, 0, h)),
            pl.BlockSpec(memory_space=pltpu.MemorySpace.SMEM),   # LayerNorm beta
        ],
        out_specs=pl.BlockSpec((1, C, t_hw), lambda b, h: (b, 0, h)),
        compiler_params=pltpu.CompilerParams(
            dimension_semantics=("parallel", "parallel"),
            vmem_limit_bytes=vmem_limit),
    )(x, ln_b)


# ----------------------------------------------------------------------------------
# Public wrapper
# ----------------------------------------------------------------------------------
def psa_channel(x_nchw, params, *, force_hw_tiling=False, hw_tile=None):
    """x_nchw: (bs, C, H, W), any float dtype.  Returns (bs, C, H, W) in x's dtype."""
    bs, C, H, W = x_nchw.shape
    HW = H * W
    x = x_nchw.reshape(bs, C, HW)

    vmem_cap, n_cores = _tpu_vmem_capacity_and_cores()
    budget = max(int(vmem_cap) * 3 // 4, 32 << 20)

    blk_io = C * HW * x.dtype.itemsize
    blk_f32 = C * HW * 4
    fused_fits = (4 * blk_io + 3 * blk_f32) <= budget
    # On multi-TC parts (v7x) a batch that cannot be split evenly across the cores
    # (bs=1, bs=3, ...) leaves a core idle on the fused batch-only grid; the tiled
    # gate kernel also parallelizes over HW and keeps both cores busy with no extra
    # HBM traffic.
    want_hw_parallel = (n_cores > 1) and (bs % n_cores != 0) and (HW >= 256)

    if force_hw_tiling or (not fused_fits) or want_hw_parallel:
        out = _psa_channel_tiled(x, params, budget=budget, vmem_cap=vmem_cap,
                                 hw_tile=hw_tile)
    else:
        out = _psa_channel_fused(x, params, budget=budget, vmem_cap=vmem_cap,
                                 n_cores=n_cores)
    return out.reshape(bs, C, H, W)


# ----------------------------------------------------------------------------------
# Pure-JAX reference (mirrors the PyTorch forward) and param init
# ----------------------------------------------------------------------------------
def psa_channel_ref(x_nchw, params):
    bs, C, H, W = x_nchw.shape
    x = x_nchw.astype(jnp.float32).reshape(bs, C, H * W)
    xv = jnp.einsum("oc,bcn->bon", params["wv_w"], x) + params["wv_b"][None]     # (bs, ch, HW)
    xq = jnp.einsum("oc,bcn->bon", params["wq_w"], x) + params["wq_b"][None]     # (bs, 1, HW)
    xq = jax.nn.softmax(xq, axis=-1)
    att = jnp.einsum("bcn,bon->bco", xv, xq)                                     # (bs, ch, 1)
    z = jnp.einsum("oc,bcn->bon", params["wz_w"], att) + params["wz_b"][None]    # (bs, C, 1)
    mean = z  # LayerNorm over trailing size-1 dim
    z_norm = (z - mean) * jax.lax.rsqrt(jnp.zeros_like(z) + LN_EPS)
    ln = z_norm * params["ln_g"][None] + params["ln_b"][None]
    s = jax.nn.sigmoid(ln)                                                       # (bs, C, 1)
    return (x * s).reshape(bs, C, H, W)


def init_params(key, in_channels, channel_factor=0.5):
    ch = int(in_channels * channel_factor)
    ks = jax.random.split(key, 6)

    def uni(k, shape, fan_in):
        bound = 1.0 / jnp.sqrt(fan_in)
        return jax.random.uniform(k, shape, jnp.float32, -bound, bound)

    return {
        "wv_w": uni(ks[0], (ch, in_channels), in_channels),
        "wv_b": uni(ks[1], (ch, 1), in_channels),
        "wq_w": uni(ks[2], (1, in_channels), in_channels),
        "wq_b": uni(ks[3], (1, 1), in_channels),
        "wz_w": uni(ks[4], (in_channels, ch), ch),
        "wz_b": uni(ks[5], (in_channels, 1), ch),
        "ln_g": jnp.ones((1, 1), jnp.float32),    # LayerNorm default init
        "ln_b": jnp.zeros((1, 1), jnp.float32),
    }


if __name__ == "__main__":
    key = jax.random.PRNGKey(0)
    k_x, k_p, k_x2, k_p2, k_ln, k_x4, k_p4, k_ln4 = jax.random.split(key, 8)

    # Case 1: lane-aligned spatial (16*16 = 256), f32, default LayerNorm params.
    bs, C, H, W = 2, 4, 16, 16
    x = jax.random.normal(k_x, (bs, C, H, W), jnp.float32)
    params = init_params(k_p, C, channel_factor=0.5)
    out = jax.block_until_ready(jax.jit(psa_channel)(x, params))
    ref = psa_channel_ref(x, params)
    assert out.shape == (bs, C, H, W)
    assert jnp.allclose(out, ref, atol=1e-5, rtol=1e-5), "mismatch vs reference (case 1)"

    # Case 2: non-128-multiple spatial (14*14 = 196, unpadded blocks with partial-lane
    # tail) and non-default LayerNorm affine params (non-trivial gate).
    bs2, C2, H2, W2 = 2, 6, 14, 14
    x2 = jax.random.normal(k_x2, (bs2, C2, H2, W2), jnp.float32)
    params2 = init_params(k_p2, C2, channel_factor=0.5)
    params2["ln_g"] = jax.random.normal(k_ln, (1, 1), jnp.float32)
    params2["ln_b"] = jax.random.normal(jax.random.fold_in(k_ln, 1), (1, 1), jnp.float32)
    out2 = jax.block_until_ready(jax.jit(psa_channel)(x2, params2))
    ref2 = psa_channel_ref(x2, params2)
    assert jnp.allclose(out2, ref2, atol=1e-5, rtol=1e-5), "mismatch vs reference (case 2)"

    # Case 3: forced HW-tiled fallback path (196 -> tiles of 128 + partial 68) with a
    # 2-D parallel grid; exercises the large-feature-map / small-batch v7x route.
    tiled_fn = jax.jit(functools.partial(psa_channel, force_hw_tiling=True, hw_tile=128))
    out3 = jax.block_until_ready(tiled_fn(x2, params2))
    assert jnp.allclose(out3, ref2, atol=1e-5, rtol=1e-5), "mismatch vs reference (case 3)"

    # Case 4: bf16 activations end-to-end (native-dtype HBM traffic, f32 in-kernel).
    bs4, C4, H4, W4 = 2, 8, 16, 16
    x4 = jax.random.normal(k_x4, (bs4, C4, H4, W4), jnp.float32).astype(jnp.bfloat16)
    params4 = init_params(k_p4, C4, channel_factor=0.5)
    params4["ln_b"] = jax.random.normal(k_ln4, (1, 1), jnp.float32)
    out4 = jax.block_until_ready(jax.jit(psa_channel)(x4, params4))
    ref4 = psa_channel_ref(x4, params4)
    assert out4.dtype == jnp.bfloat16 and out4.shape == (bs4, C4, H4, W4)
    assert jnp.allclose(out4.astype(jnp.float32), ref4, atol=2e-2, rtol=2e-2), \
        "mismatch vs reference (case 4, bf16)"

    print("KERNEL_OK")
</pallas_src>

<mosaic_0001>
module attributes {stable_mosaic.version = 11 : i64} {
  func.func @_psa_channel_kernel(%arg0: i32, %arg1: memref<1x4x256xf32, #tpu.memory_space<vmem>>, %arg2: memref<4x2xf32, #tpu.memory_space<vmem>>, %arg3: memref<1x2xf32, #tpu.memory_space<vmem>>, %arg4: memref<4x1xf32, #tpu.memory_space<vmem>>, %arg5: memref<2x4xf32, #tpu.memory_space<vmem>>, %arg6: memref<1x4xf32, #tpu.memory_space<vmem>>, %arg7: memref<1xf32, #tpu.memory_space<smem>>, %arg8: memref<1xf32, #tpu.memory_space<smem>>, %arg9: memref<1xf32, #tpu.memory_space<smem>>, %arg10: memref<1x4x256xf32, #tpu.memory_space<vmem>>) attributes {dimension_semantics = [#tpu.dimension_semantics<parallel>], iteration_bounds = array<i64: 2>, scalar_prefetch = 0 : i64, scratch_operands = 0 : i64, tpu.core_type = #tpu.core_type<tc>, window_params = [{transform_indices = @transform_0, window_bounds = array<i64: 1, 4, 256>}, {pipeline_mode = #tpu.pipeline_mode<synchronous>, transform_indices = @transform_1, window_bounds = array<i64: 4, 2>}, {pipeline_mode = #tpu.pipeline_mode<synchronous>, transform_indices = @transform_2, window_bounds = array<i64: 1, 2>}, {pipeline_mode = #tpu.pipeline_mode<synchronous>, transform_indices = @transform_3, window_bounds = array<i64: 4, 1>}, {pipeline_mode = #tpu.pipeline_mode<synchronous>, transform_indices = @transform_4, window_bounds = array<i64: 2, 4>}, {pipeline_mode = #tpu.pipeline_mode<synchronous>, transform_indices = @transform_5, window_bounds = array<i64: 1, 4>}, {transform_indices = @transform_6, window_bounds = array<i64: 1>}, {transform_indices = @transform_7, window_bounds = array<i64: 1>}, {transform_indices = @transform_8, window_bounds = array<i64: 1>}, {transform_indices = @transform_9, window_bounds = array<i64: 1, 4, 256>}]} {
    %c0 = arith.constant 0 : index
    %c0_0 = arith.constant 0 : index
    %c0_1 = arith.constant 0 : index
    %0 = vector.load %arg1[%c0, %c0_0, %c0_1] : memref<1x4x256xf32, #tpu.memory_space<vmem>>, vector<1x4x256xf32>
    %cst = arith.constant 0.000000e+00 : f32
    %1 = vector.broadcast %cst : f32 to vector<1x4xf32>
    %c0_2 = arith.constant 0 : index
    %2 = memref.load %arg8[%c0_2] : memref<1xf32, #tpu.memory_space<smem>>
    %3 = vector.broadcast %2 : f32 to vector<1x4xf32>
    %4 = arith.mulf %1, %3 : vector<1x4xf32>
    %c0_3 = arith.constant 0 : index
    %5 = memref.load %arg9[%c0_3] : memref<1xf32, #tpu.memory_space<smem>>
    %6 = vector.broadcast %5 : f32 to vector<1x4xf32>
    %7 = arith.addf %4, %6 : vector<1x4xf32>
    %8 = arith.negf %7 : vector<1x4xf32>
    %9 = math.exp %8 : vector<1x4xf32>
    %cst_4 = arith.constant 1.000000e+00 : f32
    %10 = vector.broadcast %cst_4 : f32 to vector<1x4xf32>
    %11 = arith.addf %10, %9 : vector<1x4xf32>
    %12 = arith.divf %10, %11 : vector<1x4xf32>
    %13 = vector.shape_cast %12 : vector<1x4xf32> to vector<1x4x1xf32>
    %14 = vector.broadcast %13 : vector<1x4x1xf32> to vector<1x4x256xf32>
    %15 = arith.mulf %0, %14 : vector<1x4x256xf32>
    %c0_5 = arith.constant 0 : index
    %c0_6 = arith.constant 0 : index
    %c0_7 = arith.constant 0 : index
    %16 = vector.load %arg10[%c0_5, %c0_6, %c0_7] : memref<1x4x256xf32, #tpu.memory_space<vmem>>, vector<1x4x256xf32>
    tpu.vector_store %arg10[%c0_5, %c0_6, %c0_7], %15 {strides = array<i32>} : memref<1x4x256xf32, #tpu.memory_space<vmem>>, vector<1x4x256xf32>,
    return
  }
  func.func @transform_0(%arg0: i32) -> (i32, i32, i32) {
    %c0_i32 = arith.constant 0 : i32
    %c0_i32_0 = arith.constant 0 : i32
    %c0_i32_1 = arith.constant 0 : i32
    return %arg0, %c0_i32, %c0_i32_0 : i32, i32, i32
  }
  func.func @transform_1(%arg0: i32) -> (i32, i32) {
    %c0_i32 = arith.constant 0 : i32
    %c0_i32_0 = arith.constant 0 : i32
    %c0_i32_1 = arith.constant 0 : i32
    return %c0_i32, %c0_i32_0 : i32, i32
  }
  func.func @transform_2(%arg0: i32) -> (i32, i32) {
    %c0_i32 = arith.constant 0 : i32
    %c0_i32_0 = arith.constant 0 : i32
    %c0_i32_1 = arith.constant 0 : i32
    return %c0_i32, %c0_i32_0 : i32, i32
  }
  func.func @transform_3(%arg0: i32) -> (i32, i32) {
    %c0_i32 = arith.constant 0 : i32
    %c0_i32_0 = arith.constant 0 : i32
    %c0_i32_1 = arith.constant 0 : i32
    return %c0_i32, %c0_i32_0 : i32, i32
  }
  func.func @transform_4(%arg0: i32) -> (i32, i32) {
    %c0_i32 = arith.constant 0 : i32
    %c0_i32_0 = arith.constant 0 : i32
    %c0_i32_1 = arith.constant 0 : i32
    return %c0_i32, %c0_i32_0 : i32, i32
  }
  func.func @transform_5(%arg0: i32) -> (i32, i32) {
    %c0_i32 = arith.constant 0 : i32
    %c0_i32_0 = arith.constant 0 : i32
    %c0_i32_1 = arith.constant 0 : i32
    return %c0_i32, %c0_i32_0 : i32, i32
  }
  func.func @transform_6(%arg0: i32) -> i32 {
    %c0_i32 = arith.constant 0 : i32
    %c0_i32_0 = arith.constant 0 : i32
    return %c0_i32 : i32
  }
  func.func @transform_7(%arg0: i32) -> i32 {
    %c0_i32 = arith.constant 0 : i32
    %c0_i32_0 = arith.constant 0 : i32
    return %c0_i32 : i32
  }
  func.func @transform_8(%arg0: i32) -> i32 {
    %c0_i32 = arith.constant 0 : i32
    %c0_i32_0 = arith.constant 0 : i32
    return %c0_i32 : i32
  }
  func.func @transform_9(%arg0: i32) -> (i32, i32, i32) {
    %c0_i32 = arith.constant 0 : i32
    %c0_i32_0 = arith.constant 0 : i32
    %c0_i32_1 = arith.constant 0 : i32
    return %arg0, %c0_i32, %c0_i32_0 : i32, i32, i32
  }
}

</mosaic_0001>

<bundles_post_ra>
// kernel: psa_channel.1
= control target key start
LH: loop header
LB: loop body
LE: loop exit
PB: predicated region body
PF: predicated region fallthrough
CT: control target
= control target key end

     0   :  { %s507_s5 = smov 0   ;;  %s524_s0 = inlined_call_operand.vmem [shape: f32[2,4,256], index: 0, kind: input, shape index: {}]   ;;  %s525_s1 = inlined_call_operand.vmem [shape: f32[4,2], index: 1, kind: input, shape index: {}]   ;;  %s526_s2 = inlined_call_operand.vmem [shape: f32[1,2], index: 2, kind: input, shape index: {}]   ;;  %s527_s3 = inlined_call_operand.vmem [shape: f32[4,1], index: 3, kind: input, shape index: {}]   ;;  %s528_s4 = inlined_call_operand.vmem [shape: f32[2,4], index: 4, kind: input, shape index: {}]   ;;  %s529_s5 = inlined_call_operand.vmem [shape: f32[1,4], index: 5, kind: input, shape index: {}]   ;;  %s530_s6 = inlined_call_operand.<no memory space> [shape: f32[1], index: 6, kind: input, shape index: {}]   ;;  %s531_s7 = inlined_call_operand.<no memory space> [shape: f32[1], index: 7, kind: input, shape index: {}]   ;;  %s532_s8 = inlined_call_operand.<no memory space> [shape: f32[1], index: 8, kind: input, shape index: {}]   ;;  %s533_s9 = inlined_call_operand.vmem [shape: f32[2,4,256], index: 9, kind: output, shape index: {}]  }
   0x1   :  { %15 = sst [smem:[#allocation3]] %s531_s7 }
   0x2   :  { %16 = sst [smem:[#allocation4]] %s532_s8 }
   0x3 LB: > { %s415_s6 = sadd.s32 4294967295, %s448_s5   ;;  %p419_p0 = scmp.ge.s32.totalorder %s448_s5, 1  ;;  %s448_s5 = sphi %s507_s5, %s22_s5  }
   0x4   : > { %p290_p1 = scmp.lt.s32.totalorder %s448_s5, 3 }
   0x6   : > { %p291_p2 = pnand %p419_p0, %p290_p1 }
   0x7   : > { %s337_s7 = sld [smem:[#allocation3]] (!%p291_p2)  ;;  %p326_p3 = scmp.lt.s32.totalorder (!%p291_p2), %s415_s6, 1  ;;  %v450_v7 = vmov (!%p291_p2), 839922192   ;;  %v353_v9 = vlaneseq (!%p291_p2) }
   0x8   : > { %294 = sbr.rel (%p291_p2) target bundleno = 49 (0x31), region = 56  ;;  %s340_s30 = sld [smem:[#allocation4]] (!%p291_p2)  ;;  %v351_v8 = vunpack.c.l.s4 (!%p291_p2), %v450_v7 }
   0x9   : > { %v354_v11 = vshrl.u32 (!%p291_p2), %v353_v9, 7 }
   0xa   : > { %v352_v10 = vunpack.c.0.s8 (!%p291_p2), %v351_v8 }
   0xc   : > { %v355_v12 = vsub.s32 (!%p291_p2), %v352_v10, %v354_v11 }
   0xd   : > { %v338_v0 = vstv (!%p291_p2), %s337_s7 }
   0xe   : > { %v339_v1 = vmul.f32 (!%p291_p2), 0.0, %v338_v0  ;;  %v341_v2 = vstv (!%p291_p2), %s340_s30 }
   0xf   : > { %s535_s6 = smov (!%p326_p3, %s415_s6), 1 }
  0x10   : > { %v342_v3 = vadd.f32 %v341_v2, %v339_v1  ;;  %s427_s8 = sshll.u32 %s535_s6, 3 }
  0x11   : > { %s330_s12 = scalar_lea.vmem %s524_s0, %s427_s8  ;;  %s335_s15 = scalar_lea.vmem %s533_s9, %s427_s8 }
  0x12   : > { %v424_v4 = vmul.f32 -1.442695, %v342_v3  ;;  %v336_v14 = vld [vmem:[%s330_s12] sm:$0xff] }
  0x14   : > { %438 = vpow2.f32 %v424_v4 }
  0x1e   : > { %v439_v5 = vpop.eup %438 }
  0x1f   : > { %v346_v6 = vadd.f32 1.0, %v439_v5 }
  0x21   : > { %440 = vrcp.f32 %v346_v6 }
  0x2b   : > { %v441_v13 = vpop.eup %440 }
  0x2c   : > { %v356_v15 = vrot.slane %v441_v13, %v355_v12 }
  0x2e   : > { %v358_v16 = vmul.f32 %v356_v15, %v336_v14 }
  0x30   : > { %359 = vst [vmem:[%s335_s15] sm:$0xff] %v358_v16 }
  0x31 PF: > { %s22_s5 = sadd.s32 1, %s448_s5  }
  0x32   : > { %p19_p4 = scmp.ge.s32.totalorder %s22_s5, 4  }
  0x34   :  { %21 = sbr.rel (!%p19_p4) target bundleno = 3 (0x3), region = 86 }

</bundles_post_ra>
